<compile_context>
chip_gen: v7x
topology: tpu7x:2x2x1
jax: 0.10.0
libtpu: 0.0.40
codegen_flags: <defaults>
</compile_context>

<pallas_src>
import functools

import jax
import jax.numpy as jnp
from jax.experimental import pallas as pl
from jax.experimental.pallas import tpu as pltpu

MXU_DTYPE = jnp.float32   # set to jnp.bfloat16 on v6e/v7x for ~2x MXU throughput
TILE_N = 8                # node-row tile (sublane multiple); raise for big graphs
NEG_INF = -1e30           # plain Python float -> jaxpr literal, NOT a captured Array


def _round_up(v, m):
    return (v + m - 1) // m * m


# ----------------------------------------------------------------------------- kernels
def gat_transform_kernel(x_ref, w_ref, h_ref):
    """H = X @ W for one tile of node rows. W is resident (constant block index)."""
    x = x_ref[...].astype(MXU_DTYPE)
    w = w_ref[...].astype(MXU_DTYPE)
    h_ref[...] = jnp.dot(x, w, preferred_element_type=jnp.float32)


def gat_attention_kernel(h_ref, adj_ref, att_ref, bias_ref, out_ref, *,
                         heads, c_pad, tile_n, apply_elu):
    """GAT attention + aggregation for one tile of target rows (all heads)."""
    i = pl.program_id(0)
    q0 = pl.multiple_of(i * tile_n, tile_n)

    adj = adj_ref[...]                          # [tile_n, N_pad] mask: adj[i,j]=1 if edge j->i
    adj_pos = adj > 0.0
    att = att_ref[...]                          # [2*heads, c_pad]  rows: src heads, dst heads
    bias = bias_ref[...]                        # [1, heads*c_pad]

    for hd in range(heads):
        hh_all = h_ref[:, hd * c_pad:(hd + 1) * c_pad]                 # [N_pad, c_pad]
        hh_q = h_ref[pl.ds(q0, tile_n), hd * c_pad:(hd + 1) * c_pad]   # [tile_n, c_pad]
        a_src = att[hd:hd + 1, :]                                      # [1, c_pad]
        a_dst = att[heads + hd:heads + hd + 1, :]                      # [1, c_pad]

        # GAT logits e[i,j] = LeakyReLU(a_dst.(W x_i) + a_src.(W x_j)), slope 0.2
        s_dst = jnp.einsum('qc,oc->qo', hh_q, a_dst,
                           preferred_element_type=jnp.float32)         # [tile_n, 1]
        s_src = jnp.einsum('oc,nc->on', a_src, hh_all,
                           preferred_element_type=jnp.float32)         # [1, N_pad]
        e = s_dst + s_src                                              # [tile_n, N_pad]
        e = jnp.where(e > 0.0, e, 0.2 * e)
        e = jnp.where(adj_pos, e, NEG_INF)

        # masked softmax over source nodes (exact division for accuracy)
        m = jnp.max(e, axis=1, keepdims=True)
        p = jnp.where(adj_pos, jnp.exp(e - m), 0.0)
        l = jnp.sum(p, axis=1, keepdims=True)
        p = p / l

        # aggregate neighbours, add bias, ELU between layers
        o = jnp.dot(p.astype(MXU_DTYPE), hh_all.astype(MXU_DTYPE),
                    preferred_element_type=jnp.float32)                # [tile_n, c_pad]
        z = o + bias[:, hd * c_pad:(hd + 1) * c_pad]
        if apply_elu:
            z = jnp.where(z > 0.0, z, jnp.exp(z) - 1.0)
        out_ref[:, hd * c_pad:(hd + 1) * c_pad] = z


# ----------------------------------------------------------------------------- pallas_call wrappers
def gat_transform(x_pad, w_pad):
    n_pad, in_pad = x_pad.shape
    hc = w_pad.shape[1]
    cost = pl.CostEstimate(
        flops=int(2 * n_pad * in_pad * hc),
        transcendentals=0,
        bytes_accessed=int(4 * (n_pad * in_pad + in_pad * hc + n_pad * hc)))
    return pl.pallas_call(
        gat_transform_kernel,
        out_shape=jax.ShapeDtypeStruct((n_pad, hc), jnp.float32),
        grid=(n_pad // TILE_N,),
        in_specs=[
            pl.BlockSpec((TILE_N, in_pad), lambda i: (i, 0)),   # node-row tile
            pl.BlockSpec((in_pad, hc), lambda i: (0, 0)),       # weights resident
        ],
        out_specs=pl.BlockSpec((TILE_N, hc), lambda i: (i, 0)),
        compiler_params=pltpu.CompilerParams(dimension_semantics=("parallel",)),
        cost_estimate=cost,
    )(x_pad, w_pad)


def gat_attention(h_pad, adj_pad, att_pad, bias_pad, *, heads, c_pad, apply_elu):
    n_pad, hc = h_pad.shape
    kernel = functools.partial(gat_attention_kernel, heads=heads, c_pad=c_pad,
                               tile_n=TILE_N, apply_elu=apply_elu)
    cost = pl.CostEstimate(
        flops=int(heads * (2 * n_pad * n_pad * c_pad + 4 * n_pad * c_pad + 6 * n_pad * n_pad)),
        transcendentals=int(heads * n_pad * n_pad + (n_pad * hc if apply_elu else 0)),
        bytes_accessed=int(4 * (2 * n_pad * hc + n_pad * n_pad + att_pad.size + bias_pad.size)))
    return pl.pallas_call(
        kernel,
        out_shape=jax.ShapeDtypeStruct((n_pad, hc), jnp.float32),
        grid=(n_pad // TILE_N,),
        in_specs=[
            pl.BlockSpec((n_pad, hc), lambda i: (0, 0)),        # full H resident
            pl.BlockSpec((TILE_N, n_pad), lambda i: (i, 0)),    # adjacency row tile
            pl.BlockSpec(att_pad.shape, lambda i: (0, 0)),      # attention vecs resident
            pl.BlockSpec(bias_pad.shape, lambda i: (0, 0)),     # bias resident
        ],
        out_specs=pl.BlockSpec((TILE_N, hc), lambda i: (i, 0)),
        compiler_params=pltpu.CompilerParams(dimension_semantics=("parallel",)),
        cost_estimate=cost,
    )(h_pad, adj_pad, att_pad, bias_pad)


# ----------------------------------------------------------------------------- forward / reference
def _dense_adj(edge_index, n):
    # adj[dst, src] = 1 for every edge src->dst (PyG message direction), self loops added
    adj = jnp.zeros((n, n), jnp.float32).at[edge_index[1], edge_index[0]].set(1.0)
    return jnp.maximum(adj, jnp.eye(n, dtype=jnp.float32))


def multigat_forward(x, edge_index, params):
    """x: [N, F_in]; edge_index: [2, E] (src row 0, dst row 1). Dropout p=0.0 -> identity."""
    n, f_in = x.shape
    n_pad = _round_up(max(n, TILE_N), TILE_N)

    adj = _dense_adj(edge_index, n)
    adj_pad = jnp.zeros((n_pad, n_pad), jnp.float32).at[:n, :n].set(adj)
    # give padded rows a self loop so no softmax row is fully masked (outputs discarded)
    adj_pad = jnp.maximum(adj_pad, jnp.eye(n_pad, dtype=jnp.float32))

    in_pad = _round_up(f_in, 128)
    h = jnp.zeros((n_pad, in_pad), jnp.float32).at[:n, :f_in].set(x)

    prev_heads, prev_c, prev_c_pad = 1, f_in, in_pad
    for idx, layer in enumerate(params):
        heads, c = layer["heads"], layer["out_channels"]
        c_pad = _round_up(c, 128)
        hc = heads * c_pad
        in_dim = layer["w"].shape[0]                 # = prev_heads * prev_c
        in_layout = prev_heads * prev_c_pad          # padded input layout width

        # pad W output cols per head; scatter its rows into the padded input layout
        w_cols = jnp.pad(layer["w"].reshape(in_dim, heads, c),
                         ((0, 0), (0, 0), (0, c_pad - c))).reshape(in_dim, hc)
        rows = jnp.arange(in_dim)
        rows = (rows // prev_c) * prev_c_pad + (rows % prev_c)
        w_pad = jnp.zeros((in_layout, hc), jnp.float32).at[rows].set(w_cols)

        att_pad = jnp.pad(jnp.concatenate([layer["att_src"], layer["att_dst"]], axis=0),
                          ((0, 0), (0, c_pad - c)))                    # [2*heads, c_pad]
        b_pad = jnp.pad(layer["bias"].reshape(1, heads, c),
                        ((0, 0), (0, 0), (0, c_pad - c))).reshape(1, hc)

        h = gat_transform(h, w_pad)
        h = gat_attention(h, adj_pad, att_pad, b_pad, heads=heads, c_pad=c_pad,
                          apply_elu=(idx + 1 < len(params)))
        prev_heads, prev_c, prev_c_pad = heads, c, c_pad

    out = h[:n].reshape(n, prev_heads, prev_c_pad)[:, :, :prev_c]
    return out.reshape(n, prev_heads * prev_c)


def multigat_reference(x, edge_index, params):
    n = x.shape[0]
    adj = _dense_adj(edge_index, n)
    h = x
    for idx, layer in enumerate(params):
        heads, c = layer["heads"], layer["out_channels"]
        big = h @ layer["w"]                                   # [N, heads*c]
        outs = []
        for hd in range(heads):
            hh = big[:, hd * c:(hd + 1) * c]
            s_src = hh @ layer["att_src"][hd]
            s_dst = hh @ layer["att_dst"][hd]
            e = s_dst[:, None] + s_src[None, :]
            e = jnp.where(e > 0.0, e, 0.2 * e)
            e = jnp.where(adj > 0.0, e, -jnp.inf)
            p = jax.nn.softmax(e, axis=1)
            outs.append(p @ hh)
        h = jnp.concatenate(outs, axis=1) + layer["bias"][None, :]
        if idx + 1 < len(params):
            h = jnp.where(h > 0.0, h, jnp.exp(h) - 1.0)        # ELU
    return h


# ----------------------------------------------------------------------------- demo
if __name__ == "__main__":
    key = jax.random.PRNGKey(0)
    N = 20                      # nodes (padded to 24 internally)
    E = 60                      # directed edges
    n_units = [17, 128, 100]
    n_heads = [2, 2]

    ks = jax.random.split(key, 16)
    x = jax.random.normal(ks[0], (N, n_units[0]), jnp.float32)
    src = jax.random.randint(ks[1], (E,), 0, N)
    dst = jax.random.randint(ks[2], (E,), 0, N)
    edge_index = jnp.stack([src, dst], axis=0)

    params = []
    in_dim = n_units[0]
    for li in range(len(n_units) - 1):
        heads, c = n_heads[li], n_units[li + 1]
        kw, ka, kb = jax.random.split(ks[3 + li], 3)
        w = jax.random.normal(kw, (in_dim, heads * c), jnp.float32) / jnp.sqrt(in_dim)
        att = jax.random.normal(ka, (2, heads, c), jnp.float32) / jnp.sqrt(c)
        bias = jax.random.normal(kb, (heads * c,), jnp.float32) * 0.1
        params.append(dict(w=w, att_src=att[0], att_dst=att[1], bias=bias,
                           heads=heads, out_channels=c))
        in_dim = heads * c

    out = multigat_forward(x, edge_index, params)
    out = jax.block_until_ready(out)
    ref = multigat_reference(x, edge_index, params)

    assert out.shape == (N, n_heads[-1] * n_units[-1])
    tol = 1e-3 if MXU_DTYPE == jnp.float32 else 5e-2
    err = jnp.max(jnp.abs(out - ref))
    assert jnp.allclose(out, ref, rtol=tol, atol=tol), f"mismatch vs reference: {err}"
    print("KERNEL_OK")
</pallas_src>

<mosaic_0001>
module attributes {stable_mosaic.version = 11 : i64} {
  func.func @gat_transform_kernel(%arg0: i32, %arg1: memref<8x128xf32, #tpu.memory_space<vmem>>, %arg2: memref<128x256xf32, #tpu.memory_space<vmem>>, %arg3: memref<8x256xf32, #tpu.memory_space<vmem>>) attributes {dimension_semantics = [#tpu.dimension_semantics<parallel>], iteration_bounds = array<i64: 3>, scalar_prefetch = 0 : i64, scratch_operands = 0 : i64, tpu.core_type = #tpu.core_type<tc>, window_params = [{transform_indices = @transform_0, window_bounds = array<i64: 8, 128>}, {pipeline_mode = #tpu.pipeline_mode<synchronous>, transform_indices = @transform_1, window_bounds = array<i64: 128, 256>}, {transform_indices = @transform_2, window_bounds = array<i64: 8, 256>}]} {
    %c0 = arith.constant 0 : index
    %c0_0 = arith.constant 0 : index
    %0 = vector.load %arg1[%c0, %c0_0] : memref<8x128xf32, #tpu.memory_space<vmem>>, vector<8x128xf32>
    %c0_1 = arith.constant 0 : index
    %c0_2 = arith.constant 0 : index
    %1 = vector.load %arg2[%c0_1, %c0_2] : memref<128x256xf32, #tpu.memory_space<vmem>>, vector<128x256xf32>
    %cst = arith.constant dense<0.000000e+00> : vector<8x256xf32>
    %2 = tpu.matmul %0, %1, %cst {dimension_numbers = #tpu.dot_dimension_numbers<[1], [0], [0], [1], [0, 0, 1, 1], [], []>} : vector<8x128xf32>, vector<128x256xf32>, vector<8x256xf32> -> vector<8x256xf32>
    %c0_3 = arith.constant 0 : index
    %c0_4 = arith.constant 0 : index
    %3 = vector.load %arg3[%c0_3, %c0_4] : memref<8x256xf32, #tpu.memory_space<vmem>>, vector<8x256xf32>
    tpu.vector_store %arg3[%c0_3, %c0_4], %2 {strides = array<i32>} : memref<8x256xf32, #tpu.memory_space<vmem>>, vector<8x256xf32>,
    return
  }
  func.func @transform_0(%arg0: i32) -> (i32, i32) {
    %c0_i32 = arith.constant 0 : i32
    %c0_i32_0 = arith.constant 0 : i32
    return %arg0, %c0_i32 : i32, i32
  }
  func.func @transform_1(%arg0: i32) -> (i32, i32) {
    %c0_i32 = arith.constant 0 : i32
    %c0_i32_0 = arith.constant 0 : i32
    %c0_i32_1 = arith.constant 0 : i32
    return %c0_i32, %c0_i32_0 : i32, i32
  }
  func.func @transform_2(%arg0: i32) -> (i32, i32) {
    %c0_i32 = arith.constant 0 : i32
    %c0_i32_0 = arith.constant 0 : i32
    return %arg0, %c0_i32 : i32, i32
  }
}

</mosaic_0001>

<bundles_post_ra>
// kernel: tpu_custom_call.1
= control target key start
LH: loop header
LB: loop body
LE: loop exit
PB: predicated region body
PF: predicated region fallthrough
CT: control target
= control target key end

     0   :  { %7 = vsyncpa [#allocation3], 0  ;;  %s825_s0 = inlined_call_operand.hbm [shape: f32[24,128], index: 0, kind: input, shape index: {}]   ;;  %s826_s1 = inlined_call_operand.hbm [shape: f32[128,256], index: 1, kind: input, shape index: {}]   ;;  %s827_s2 = inlined_call_operand.hbm [shape: f32[24,256], index: 2, kind: output, shape index: {}]  }
   0x1   :  { %9 = vsyncpa [#allocation3 + $0x1], 0 }
   0x2   :  { %10 = vsyncpa [#allocation6], 0 }
   0x3   :  { %11 = vsyncpa [#allocation4], 0 }
   0x4   :  { %13 = vsyncpa [#allocation4 + $0x1], 0  ;;  %s634_s9 = smov 0   ;;  %s636_s10 = smov 0  }
   0x5   :  { %s638_s11 = smov 0   ;;  %s640_s12 = smov 0  }
   0x6 LB: > { %s655_s13 = sadd.s32 4294967295, %s611_s12   ;;  %s375_s14 = sadd.s32 4294967294, %s611_s12   ;;  %s611_s12 = sphi %s640_s12, %s846_s12   ;;  %s607_s11 = sphi %s638_s11, %s845_s11   ;;  %s603_s10 = sphi %s636_s10, %s844_s10   ;;  %s599_s9 = sphi %s634_s9, %s843_s9  }
   0x7   : > { %p39_p0 = scmp.ne.s32.totalorder %s603_s10, %s599_s9  ;;  %p828_p1 = scmp.eq.s32.totalorder %s655_s13, 0 }
   0x8   : > { %p90_p3 = scmp.eq.s32.totalorder %s375_s14, 2  ;;  %p376_p5 = scmp.ge.s32.totalorder %s611_s12, 1 }
   0x9   : > { %p664_p4 = por %p828_p1, %p39_p0  ;;  %p97_p7 = scmp.lt.s32.totalorder %s611_s12, 4 }
   0xa   : > { %p669_p6 = por %p90_p3, %p39_p0  ;;  %s613_s18 = smov [#allocation5]  }
   0xb   : > { %s831_s15 = scalar_select %p664_p4, 1, 0 }
   0xc   : > { %s832_s16 = scalar_select %p669_p6, 1, 0 }
   0xd   : > { %p674_p8 = pnand %p376_p5, %p97_p7  ;;  %s109_s19 = sshll.u32 %s613_s18, 4  ;;  %s110_s19 = int_to_ptr.vmem [resolvable:$true] %s109_s19 }
   0xe   : > { %s687_s21 = sadd.s32 1, %s611_s12   ;;  %s26_s22 = sadd.s32 1, %s607_s11 }
   0xf   : > { %s833_s17 = scalar_select %p674_p8, 1, 0 }
  0x10   : > { %p431_p9 = pneg %p674_p8  ;;  %s23_s23 = ssub.s32 %s611_s12, %s687_s21 }
  0x11   : > { %s483_s26 = scalar_lea.hbm %s826_s1, 4096 }
  0x12   : > { %p682_p10 = pnand %p431_p9, %p828_p1  ;;  %p484_p11 = scmp.ne.s32.totalorder %s826_s1, %s483_s26 }
  0x13   : > { %p490_p3 = scmp.lt.u32.totalorder %s483_s26, %s826_s1 }
  0x14   : > { %p485_p12 = pneg %p682_p10 }
  0x16   : > { %p486_p13 = pnand %p485_p12, %p484_p11 }
  0x18   : > { %p487_p0 = pneg %p486_p13 }
  0x1a   : > { %p492_p5 = pnand %p490_p3, %p487_p0 }
  0x1c   : > { %495 = shalt.err (!%p492_p5)
}
  0x1d   : > { %s496_s3 = scalar_lea.vmem %s110_s19, 4096  ;;  %p504_p2 = scmp.lt.s32.totalorder %s110_s19, %s110_s19 }
  0x1e   : > { %p497_p7 = scmp.ne.s32.totalorder %s110_s19, %s496_s3  ;;  %p505_p6 = scmp.lt.s32.totalorder %s496_s3, %s496_s3 }
  0x20   : > { %p499_p9 = pnand %p497_p7, %p485_p12  ;;  %p506_p4 = por %p505_p6, %p504_p2 }
  0x22   : > { %p500_p1 = pneg %p499_p9 }
  0x24   : > { %p507_p8 = pnand %p506_p4, %p500_p1 }
  0x26   : > { %510 = shalt.err (!%p507_p8)
}
  0x27   : > { %s614_s4 = smov 256   ;;  %s615_s5 = smov 16  }
  0x28   : > { %434 = dma.hbm_to_vmem [thread:$0]  (!%p682_p10), %s826_s1, 4096, %s110_s19, [#allocation6], %s614_s4, %s614_s4, %s615_s5  }
  0x29   : > { %p24_p11 = scmp.eq.s32.totalorder %s23_s23, 0  ;;  %p33_p2 = scmp.ne.s32.totalorder %s607_s11, %s603_s10 }
  0x2a   : > { %p34_p1 = scmp.eq.s32.totalorder %s611_s12, 0  ;;  %p444_p4 = scmp.lt.s32.totalorder %s611_s12, 3 }
  0x2b   : > { %s713_s8 = scalar_select %p24_p11, %s607_s11, %s26_s22  }
  0x2c   : > { %p35_p6 = por %p34_p1, %p33_p2  ;;  %p835_p8 = scmp.eq.s32.totalorder %s655_s13, 2 }
  0x2d   : > { %s123_s18 = sand.u32 1, %s607_s11   ;;  %s380_s24 = sshll.u32 %s611_s12, 7 }
  0x2e   : > { %p717_p12 = por %p835_p8, %p33_p2  ;;  %s379_s25 = sshll.u32 %s123_s18, 3 }
  0x2f   : > { %s726_s27 = scalar_lea.hbm %s825_s0, %s380_s24  ;;  %s127_s19 = scalar_lea.vmem [#allocation2], %s379_s25 }
  0x30   : > { %s134_s22 = sshll.u32 %s127_s19, 4  ;;  %p728_p10 = pnand %p444_p4, %p35_p6  ;;  %s732_s22 = int_to_ptr.vmem [resolvable:$true] %s134_s22 }
  0x31   : > { %s124_s28 = scalar_lea.sflag [#allocation3], %s123_s18  ;;  %s511_s29 = scalar_lea.hbm %s726_s27, 128 }
  0x32   : > { %p512_p13 = scmp.ne.s32.totalorder %s726_s27, %s511_s29  ;;  %p513_p0 = pneg %p728_p10 }
  0x33   : > { %s516_s4 = scalar_lea.hbm %s825_s0, 384  ;;  %p517_p7 = scmp.lt.u32.totalorder %s726_s27, %s825_s0 }
  0x34   : > { %p514_p3 = pnand %p513_p0, %p512_p13  ;;  %p518_p9 = scmp.lt.u32.totalorder %s516_s4, %s511_s29 }
  0x35   : > { %p520_p2 = scmp.lt.u32.totalorder %s511_s29, %s726_s27 }
  0x36   : > { %p515_p5 = pneg %p514_p3  ;;  %p519_p11 = por %p518_p9, %p517_p7 }
  0x38   : > { %p521_p1 = por %p520_p2, %p519_p11 }
  0x3a   : > { %p522_p4 = pnand %p521_p1, %p515_p5 }
  0x3c   : > { %525 = shalt.err (!%p522_p4)
}
  0x3d   : > { %s526_s7 = scalar_lea.vmem %s732_s22, 128  ;;  %s616_s18 = smov [#allocation2]  }
  0x3e   : > { %p527_p6 = scmp.ne.s32.totalorder %s732_s22, %s526_s7  ;;  %s531_s24 = sshll.u32 %s616_s18, 4  ;;  %s532_s24 = int_to_ptr.vmem [resolvable:$false] %s531_s24 }
  0x3f   : > { %s533_s25 = scalar_lea.vmem %s532_s24, 256  ;;  %p534_p3 = scmp.lt.s32.totalorder %s732_s22, %s532_s24 }
  0x40   : > { %p529_p8 = pnand %p527_p6, %p513_p0  ;;  %p535_p7 = scmp.lt.s32.totalorder %s533_s25, %s526_s7 }
  0x42   : > { %p530_p13 = pneg %p529_p8  ;;  %p536_p9 = por %p535_p7, %p534_p3 }
  0x44   : > { %p537_p11 = pnand %p536_p9, %p530_p13 }
  0x46   : > { %540 = shalt.err (!%p537_p11)
}
  0x47   : > { %438 = dma.hbm_to_vmem [thread:$0]  (!%p728_p10), %s726_s27, 128, %s732_s22, %s124_s28  }
  0x48   : > { %p838_p5 = scmp.ne.s32.totalorder %s833_s17, 0 }
  0x49   : > { %s762_s20 = sand.u32 (!%p838_p5), 1, %s603_s10   ;;  %p839_p0 = scmp.ne.s32.totalorder (!%p838_p5), %s831_s15, 0 }
  0x4a   : > { %143 = sbr.rel (%p838_p5) target bundleno = 347 (0x15b), region = 28  ;;  %s382_s26 = sshll.u32 (!%p838_p5), %s762_s20, 3 }
  0x4b   : > { %s146_s19 = scalar_lea.sflag (!%p838_p5), [#allocation3], %s762_s20  ;;  %s766_s29 = scalar_lea.vmem (!%p838_p5), [#allocation2], %s382_s26 }
  0x51   : > { %586 = dma.done.wait (%p839_p0), %s146_s19, 128  }
  0x52   : > { %588 = vsyncadd (%p839_p0), %s146_s19, 4294967168  ;;  %p840_p10 = scmp.eq.s32.totalorder %s655_s13, 0 }
  0x54   : > { %590 = dma.done.wait (%p840_p10), [#allocation6], 4096   ;;  %p841_p2 = pmov %p840_p10 }
  0x55   : > { %v617_v0 = vmov 0.0   ;;  %v176_v1 = vld [vmem:[#allocation5 + $0x8] sm:$0xff]  ;;  %v178_v2 = vld [vmem:[#allocation5 + $0x18] sm:$0xff]  ;;  %v175_v3 = vld [vmem:[#allocation5] sm:$0xff]  ;;  %s384_s15 = sshll.u32 %s762_s20, 4  ;;  %s390_s22 = sshll.u32 %s655_s13, 8 }
  0x56   : > { %592 = vsyncadd (%p841_p2), [#allocation6], 4294963200  ;;  %271 = vmatprep.mubr.f32.mxu0 %v617_v0  ;;  %v391_v4 = vpack.c.bf16 %v178_v2, %v176_v1  ;;  %v177_v5 = vld [vmem:[#allocation5 + $0x10] sm:$0xff]  ;;  %v180_v6 = vld [vmem:[#allocation5 + $0x28] sm:$0xff]  ;;  %s173_s17 = scalar_lea.vmem [#allocation7], %s384_s15  ;;  %s784_s30 = scalar_lea.hbm %s827_s2, %s390_s22 }
  0x57   : > { %v182_v7 = vld [vmem:[#allocation5 + $0x38] sm:$0xff]  ;;  %v393_v8 = vpack.c.bf16 %v177_v5, %v175_v3  ;;  %v179_v10 = vld [vmem:[#allocation5 + $0x20] sm:$0xff]  ;;  %v181_v11 = vld [vmem:[#allocation5 + $0x30] sm:$0xff]  ;;  %s295_s27 = sshll.u32 %s173_s17, 4  ;;  %s281_s3 = scalar_lea.sflag [#allocation4], %s762_s20  ;;  %s779_s27 = int_to_ptr.vmem [resolvable:$true] %s295_s27 }
  0x58   : > { %v395_v9 = vpack.c.bf16 %v182_v7, %v180_v6  ;;  %v184_v12 = vld [vmem:[#allocation5 + $0x48] sm:$0xff]  ;;  %392 = vmatprep.subr.bf16.mxu0 %v391_v4  ;;  %v186_v13 = vld [vmem:[#allocation5 + $0x58] sm:$0xff]  ;;  %v397_v14 = vpack.c.bf16 %v181_v11, %v179_v10  ;;  %v183_v16 = vld [vmem:[#allocation5 + $0x40] sm:$0xff]  ;;  %s541_s4 = scalar_lea.vmem %s779_s27, 256  ;;  %s618_s13 = smov [#allocation7]  }
  0x59   : > { %394 = vmatpush1.bf16.msra.mxu0 %v393_v8  ;;  %v399_v15 = vpack.c.bf16 %v186_v13, %v184_v12  ;;  %v185_v17 = vld [vmem:[#allocation5 + $0x50] sm:$0xff]  ;;  %v188_v18 = vld [vmem:[#allocation5 + $0x68] sm:$0xff]  ;;  %v190_v19 = vld [vmem:[#allocation5 + $0x78] sm:$0xff]  ;;  %p542_p1 = scmp.ne.s32.totalorder %s779_s27, %s541_s4  ;;  %s545_s5 = sshll.u32 %s618_s13, 4  ;;  %s546_s5 = int_to_ptr.vmem [resolvable:$false] %s545_s5 }
  0x5a   : > { %396 = vmatprep.subr.bf16.mxu0 %v395_v9  ;;  %v401_v20 = vpack.c.bf16 %v185_v17, %v183_v16  ;;  %v403_v21 = vpack.c.bf16 %v190_v19, %v188_v18  ;;  %v187_v22 = vld [vmem:[#allocation5 + $0x60] sm:$0xff]  ;;  %v189_v23 = vld [vmem:[#allocation5 + $0x70] sm:$0xff]  ;;  %v192_v24 = vld [vmem:[#allocation5 + $0x88] sm:$0xff]  ;;  %s547_s6 = scalar_lea.vmem %s546_s5, 512  ;;  %p548_p8 = scmp.lt.s32.totalorder %s779_s27, %s546_s5 }
  0x5b   : > { %v194_v25 = vld [vmem:[#allocation5 + $0x98] sm:$0xff]  ;;  %v405_v26 = vpack.c.bf16 %v189_v23, %v187_v22  ;;  %v191_v28 = vld [vmem:[#allocation5 + $0x80] sm:$0xff]  ;;  %v193_v29 = vld [vmem:[#allocation5 + $0x90] sm:$0xff]  ;;  %p543_p4 = pnand %p542_p1, %p717_p12  ;;  %p549_p13 = scmp.lt.s32.totalorder %s547_s6, %s541_s4 }
  0x5c   : > { %v407_v27 = vpack.c.bf16 %v194_v25, %v192_v24  ;;  %v196_v30 = vld [vmem:[#allocation5 + $0xa8] sm:$0xff]  ;;  %v198_v31 = vld [vmem:[#allocation5 + $0xb8] sm:$0xff]  ;;  %v409_v32 = vpack.c.bf16 %v193_v29, %v191_v28  ;;  %v195_v34 = vld [vmem:[#allocation5 + $0xa0] sm:$0xff] }
  0x5d   : > { %398 = vmatpush1.bf16.msra.mxu0 %v397_v14  ;;  %v411_v33 = vpack.c.bf16 %v198_v31, %v196_v30  ;;  %v197_v35 = vld [vmem:[#allocation5 + $0xb0] sm:$0xff]  ;;  %v200_v36 = vld [vmem:[#allocation5 + $0xc8] sm:$0xff]  ;;  %v202_v37 = vld [vmem:[#allocation5 + $0xd8] sm:$0xff]  ;;  %p544_p6 = pneg %p543_p4  ;;  %p550_p3 = por %p549_p13, %p548_p8 }
  0x5e   : > { %400 = vmatprep.subr.bf16.mxu0 %v399_v15  ;;  %v413_v38 = vpack.c.bf16 %v197_v35, %v195_v34  ;;  %v415_v39 = vpack.c.bf16 %v202_v37, %v200_v36  ;;  %v199_v40 = vld [vmem:[#allocation5 + $0xc0] sm:$0xff]  ;;  %v201_v41 = vld [vmem:[#allocation5 + $0xd0] sm:$0xff]  ;;  %v204_v42 = vld [vmem:[#allocation5 + $0xe8] sm:$0xff] }
  0x5f   : > { %v206_v43 = vld [vmem:[#allocation5 + $0xf8] sm:$0xff]  ;;  %v417_v44 = vpack.c.bf16 %v201_v41, %v199_v40  ;;  %v203_v46 = vld [vmem:[#allocation5 + $0xe0] sm:$0xff]  ;;  %v205_v47 = vld [vmem:[#allocation5 + $0xf0] sm:$0xff]  ;;  %p551_p7 = pnand %p550_p3, %p544_p6 }
  0x60   : > { %v419_v45 = vpack.c.bf16 %v206_v43, %v204_v42  ;;  %v421_v48 = vpack.c.bf16 %v205_v47, %v203_v46  ;;  %v174_v49 = vld [vmem:[%s766_s29] sm:$0xff] }
  0x61   : > { %402 = vmatpush1.bf16.msra.mxu0 %v401_v20 }
  0x62   : > { %404 = vmatprep.subr.bf16.mxu0 %v403_v21 }
  0x65   : > { %406 = vmatpush1.bf16.msra.mxu0 %v405_v26 }
  0x66   : > { %408 = vmatprep.subr.bf16.mxu0 %v407_v27 }
  0x69   : > { %410 = vmatpush1.bf16.msra.mxu0 %v409_v32 }
  0x6a   : > { %412 = vmatprep.subr.bf16.mxu0 %v411_v33 }
  0x6d   : > { %414 = vmatpush1.bf16.msra.mxu0 %v413_v38 }
  0x6e   : > { %416 = vmatprep.subr.bf16.mxu0 %v415_v39 }
  0x71   : > { %418 = vmatpush1.bf16.msra.mxu0 %v417_v44 }
  0x72   : > { %420 = vmatprep.subr.bf16.mxu0 %v419_v45 }
  0x75   : > { %422 = vmatpush1.bf16.msra.mxu0 %v421_v48 }
  0x78   : > { %272 = vmatmul.mubr.f32.vlgmr.msra.gmra.mrb[0].mxu0 %v174_v49 }
 0x14b   : > { %v273_v50 = vpop.f32.mrb[0].mxu0 }
 0x14c   : > { %278 = vst [vmem:[%s173_s17] sm:$0xff] %v273_v50  ;;  %v275_v51 = vpop.f32.mrb[1].mxu0 }
 0x14d   : > { %279 = vst [vmem:[%s173_s17 + $0x8] sm:$0xff] %v275_v51 }
 0x14e   : > { %554 = shalt.err (!%p551_p7)
}
 0x14f   : > { %s555_s7 = scalar_lea.hbm %s784_s30, 256  ;;  %s559_s25 = scalar_lea.hbm %s827_s2, 768 }
 0x150   : > { %p556_p9 = scmp.ne.s32.totalorder %s784_s30, %s555_s7  ;;  %p560_p0 = scmp.lt.u32.totalorder %s784_s30, %s827_s2 }
 0x151   : > { %p561_p10 = scmp.lt.u32.totalorder %s559_s25, %s555_s7  ;;  %p563_p1 = scmp.lt.u32.totalorder %s555_s7, %s784_s30 }
 0x152   : > { %p557_p11 = pnand %p556_p9, %p717_p12 }
 0x153   : > { %p562_p2 = por %p561_p10, %p560_p0 }
 0x154   : > { %p558_p5 = pneg %p557_p11 }
 0x155   : > { %p564_p4 = por %p563_p1, %p562_p2 }
 0x157   : > { %p565_p6 = pnand %p564_p4, %p558_p5 }
 0x159   : > { %568 = shalt.err (!%p565_p6)
}
 0x15a   : > { %429 = dma.vmem_to_hbm [thread:$0]  (%p717_p12), %s779_s27, 256, %s784_s30, %s281_s3  }
 0x15b PF: > { %p446_p8 = scmp.ge.s32.totalorder %s611_s12, 2  ;;  %s307_s19 = sand.u32 1, %s599_s9  }
 0x15c   : > { %p842_p13 = scmp.ne.s32.totalorder %s832_s16, 0  ;;  %s308_s29 = scalar_lea.sflag [#allocation4], %s307_s19 }
 0x15e   : > { %p440_p3 = pnand %p446_p8, %p842_p13 }
 0x160   : > { %594 = dma.done.wait (!%p440_p3), %s308_s29, 256  }
 0x161   : > { %596 = vsyncadd (!%p440_p3), %s308_s29, 4294967040  ;;  %p16_p7 = scmp.ge.s32.totalorder %s687_s21, 5   ;;  %s843_s9 = smov %s603_s10 }
 0x162   : > { %s844_s10 = smov %s607_s11  ;;  %s845_s11 = smov %s713_s8 }
 0x163   : > { %s846_s12 = smov %s687_s21  ;;  %18 = sbr.rel (!%p16_p7) target bundleno = 6 (0x6), region = 77 }
 0x16a   :  { %313 = vsyncpa [#allocation3], 1 }
 0x16b   :  { %315 = vsyncpa [#allocation3 + $0x1], 1 }
 0x16c   :  { %316 = vsyncpa [#allocation6], 1 }
 0x16d   :  { %317 = vsyncpa [#allocation4], 1 }
 0x16e   :  { %319 = vsyncpa [#allocation4 + $0x1], 1 }

</bundles_post_ra>
